<compile_context>
chip_gen: v7x
topology: tpu7x:2x2x1
jax: 0.10.0
libtpu: 0.0.40
codegen_flags: <defaults>
</compile_context>

<pallas_src>
import jax
import jax.numpy as jnp
from jax.experimental import pallas as pl
from jax.experimental.pallas import tpu as pltpu


def _round_up(n, m):
    return ((n + m - 1) // m) * m


def _cdiv(a, b):
    return (a + b - 1) // b


def _tpu_limits():
    """Best-effort hardware query: (physical VMEM bytes, has-2-TensorCores)."""
    vmem_cap = 64 << 20          # conservative default (v7x per-TC)
    two_cores = False
    try:
        info = pltpu.get_tpu_info()
        vmem_cap = int(getattr(info, "vmem_capacity_bytes", vmem_cap))
    except Exception:
        pass
    try:
        kind = jax.devices()[0].device_kind.lower()
        if "v7" in kind:
            two_cores = True
    except Exception:
        pass
    return vmem_cap, two_cores


# ---------------------------------------------------------------------------
# Kernel
# ---------------------------------------------------------------------------
def _mlp_kernel(x_ref, w1_ref, b1_ref, w2_ref, b2_ref, out_ref, acc_ref):
    # x_ref:  (TB, TF) f32      w1_ref: (TF, Hp) bf16   b1_ref: (1, Hp) f32
    # w2_ref: (Hp, Cp) bf16     b2_ref: (1, Cp) f32
    # out_ref: (TB, Cp) f32     acc_ref: (TB, Hp) f32 scratch
    k = pl.program_id(1)

    # Cast x on the VPU (free filler under the MXU); f32 accumulate on the MXU.
    partial = jnp.dot(x_ref[...].astype(jnp.bfloat16), w1_ref[...],
                      preferred_element_type=jnp.float32)

    @pl.when(k == 0)
    def _():
        acc_ref[...] = partial          # init-with-first-dot (no zero-fill)

    @pl.when(k > 0)
    def _():
        acc_ref[...] += partial

    @pl.when(k == pl.num_programs(1) - 1)
    def _():
        # Bias + ReLU in f32, second layer bf16 on MXU with f32 accumulate.
        h = jnp.maximum(acc_ref[...] + b1_ref[...], 0.0)
        logits = jnp.dot(h.astype(w2_ref.dtype), w2_ref[...],
                         preferred_element_type=jnp.float32) + b2_ref[...]
        out_ref[...] = logits.astype(out_ref.dtype)


# ---------------------------------------------------------------------------
# One-time (model-load-time) weight preparation: pad + cast + pick tile_f.
# ---------------------------------------------------------------------------
_TILE_B_MAX = 512


def prepare_tfidf_params(w1, b1, w2, b2):
    F, H = w1.shape
    Hw, C = w2.shape
    assert Hw == H and b1.shape == (H,) and b2.shape == (C,)

    H_pad = _round_up(H, 128)
    C_pad = _round_up(C, 128)
    F128 = _round_up(F, 128)

    vmem_cap, two_cores = _tpu_limits()
    vmem_clamp = int(min(vmem_cap * 0.85, 100 << 20))   # ~54 MiB v7x, 100 MiB v5e/v6e

    # Budget-driven tile_f (assume the largest batch tile we will ever use).
    headroom = 6 << 20
    fixed = (2 * H_pad * C_pad * 2                    # W2 (bf16, double-buffered)
             + 2 * (H_pad + C_pad) * 4                # biases
             + 2 * _TILE_B_MAX * C_pad * 4            # out tile
             + _TILE_B_MAX * H_pad * 4                # accumulator scratch
             + _TILE_B_MAX * H_pad * 4                # h (f32 epilogue temp)
             + _TILE_B_MAX * H_pad * 2                # h cast to bf16
             + _TILE_B_MAX * C_pad * 4)               # logits temp
    avail = max(vmem_clamp - headroom - fixed, 2 << 20)
    per_f = 2 * _TILE_B_MAX * 4 + 2 * H_pad * 2       # x (f32) + W1 (bf16), dbl-buffered
    max_tf = max(128, (avail // per_f) // 128 * 128)

    if max_tf >= F128:
        tile_f, F_pad = F128, F128                    # K axis collapses to 1 step
    else:
        nsteps = _cdiv(F128, max_tf)
        tile_f = _round_up(_cdiv(F128, nsteps), 128)  # keeps padding waste tiny
        F_pad = nsteps * tile_f

    # Pad + cast weights ONCE, in kernel layout.
    w1_p = jnp.pad(w1, ((0, F_pad - F), (0, H_pad - H))).astype(jnp.bfloat16)
    b1_p = jnp.pad(b1, ((0, H_pad - H),)).reshape(1, H_pad).astype(jnp.float32)
    w2_p = jnp.pad(w2, ((0, H_pad - H), (0, C_pad - C))).astype(jnp.bfloat16)
    b2_p = jnp.pad(b2, ((0, C_pad - C),)).reshape(1, C_pad).astype(jnp.float32)

    return {
        "w1": w1_p, "b1": b1_p, "w2": w2_p, "b2": b2_p,
        "F": F, "H": H, "C": C,
        "F_pad": F_pad, "H_pad": H_pad, "C_pad": C_pad,
        "tile_f": tile_f,
        "vmem_clamp": vmem_clamp, "two_cores": two_cores,
    }


# ---------------------------------------------------------------------------
# Forward
# ---------------------------------------------------------------------------
def tfidf_classifier_forward(x, params, *, tile_b=None):
    """Fused [B,F] @ [F,H] -> +b1 -> ReLU -> @ [H,C] + b2.  Returns [B,C] f32 logits."""
    B, F = x.shape
    assert F == params["F"], "feature dim mismatch with prepared params"
    F_pad, H_pad, C_pad = params["F_pad"], params["H_pad"], params["C_pad"]
    tile_f = params["tile_f"]

    # --- batch tiling --------------------------------------------------------
    B16 = _round_up(max(B, 1), 16)
    if tile_b is None:
        tile_b = min(_TILE_B_MAX, B16)
        # On 2-TC chips keep >=2 batch tiles so megacore can shard the
        # "parallel" batch axis (each core then streams W1 once).
        if params["two_cores"] and B16 >= 32:
            tile_b = min(tile_b, _round_up(_cdiv(B16, 2), 16))
    tile_b = max(16, _round_up(min(tile_b, _TILE_B_MAX), 16))
    B_pad = _round_up(B, tile_b)

    # --- pad x (zero padding is exact for matmul + ReLU); keep f32 ----------
    x = x.astype(jnp.float32)
    if B_pad != B or F_pad != F:
        x = jnp.pad(x, ((0, B_pad - B), (0, F_pad - F)))

    grid = (B_pad // tile_b, F_pad // tile_f)

    # --- VMEM budget (double-buffered I/O + accumulator + epilogue temps) ---
    bytes_needed = (
        2 * (tile_b * tile_f * 4)          # x tile (f32)
        + 2 * (tile_f * H_pad * 2)         # W1 tile (bf16)
        + 2 * (H_pad * 4 + C_pad * 4)      # biases
        + 2 * (H_pad * C_pad * 2)          # W2 (bf16)
        + 2 * (tile_b * C_pad * 4)         # out tile (f32)
        + tile_b * H_pad * 4               # accumulator scratch
        + tile_b * H_pad * 4               # h (f32)
        + tile_b * H_pad * 2               # h (bf16)
        + tile_b * C_pad * 4               # logits temp
    )
    vmem_limit = int(min(max(bytes_needed + (6 << 20), 32 << 20),
                         params["vmem_clamp"]))

    n_btiles = B_pad // tile_b
    flops = 2 * B_pad * F_pad * H_pad + 2 * B_pad * H_pad * C_pad
    bytes_accessed = int(
        B_pad * F_pad * 4                      # x (f32, read once)
        + n_btiles * F_pad * H_pad * 2         # W1 re-streamed per batch tile
        + n_btiles * (H_pad * C_pad * 2 + H_pad * 4 + C_pad * 4)
        + B_pad * C_pad * 4                    # logits out
    )

    out = pl.pallas_call(
        _mlp_kernel,
        out_shape=jax.ShapeDtypeStruct((B_pad, C_pad), jnp.float32),
        grid_spec=pltpu.PrefetchScalarGridSpec(
            num_scalar_prefetch=0,
            grid=grid,
            in_specs=[
                pl.BlockSpec((tile_b, tile_f), lambda i, k: (i, k)),   # x tile
                pl.BlockSpec((tile_f, H_pad), lambda i, k: (k, 0)),    # W1 tile
                pl.BlockSpec((1, H_pad), lambda i, k: (0, 0)),         # b1
                pl.BlockSpec((H_pad, C_pad), lambda i, k: (0, 0)),     # W2
                pl.BlockSpec((1, C_pad), lambda i, k: (0, 0)),         # b2
            ],
            out_specs=pl.BlockSpec((tile_b, C_pad), lambda i, k: (i, 0)),
            scratch_shapes=[pltpu.VMEM((tile_b, H_pad), jnp.float32)],
        ),
        compiler_params=pltpu.CompilerParams(
            dimension_semantics=("parallel", "arbitrary"),
            vmem_limit_bytes=vmem_limit,
        ),
        cost_estimate=pl.CostEstimate(
            flops=int(flops), transcendentals=0, bytes_accessed=bytes_accessed),
    )(x, params["w1"], params["b1"], params["w2"], params["b2"])

    # Slice away batch and class padding (padded W2/b2 columns are zero, so
    # padded logits never leak even if a caller forgets this slice).
    return out[:B, : params["C"]]


def _torch_like_linear_init(key, fan_in, fan_out):
    """Deterministic init mimicking nn.Linear default: U(-1/sqrt(fan_in), +1/sqrt(fan_in))."""
    kw, kb = jax.random.split(key)
    bound = 1.0 / jnp.sqrt(jnp.float32(fan_in))
    w = jax.random.uniform(kw, (fan_in, fan_out), jnp.float32, -bound, bound)
    b = jax.random.uniform(kb, (fan_out,), jnp.float32, -bound, bound)
    return w, b


if __name__ == "__main__":
    # Small shapes consistent with the module's forward:
    #   batch B=8, TF-IDF feature dim F=300 (exercises F/C/B padding paths),
    #   hidden H=512 (hidden_dims default), num_classes C=2.
    B, F, H, C = 8, 300, 512, 2

    key = jax.random.PRNGKey(0)
    kx, k1, k2 = jax.random.split(key, 3)

    # Synthetic non-negative TF-IDF-ish features.
    x = jax.random.uniform(kx, (B, F), jnp.float32, 0.0, 1.0)

    w1, b1 = _torch_like_linear_init(k1, F, H)
    w2, b2 = _torch_like_linear_init(k2, H, C)

    # One-time weight prep (model load time), then the cheap per-call forward.
    params = prepare_tfidf_params(w1, b1, w2, b2)
    logits = tfidf_classifier_forward(x, params)
    logits = jax.block_until_ready(logits)
    assert logits.shape == (B, C)

    # Reference emulating the kernel's numerics (bf16 operands, f32 accumulate).
    xb = x.astype(jnp.bfloat16).astype(jnp.float32)
    w1b = w1.astype(jnp.bfloat16).astype(jnp.float32)
    w2b = w2.astype(jnp.bfloat16).astype(jnp.float32)
    h_ref = jnp.maximum(xb @ w1b + b1, 0.0)
    ref = h_ref.astype(jnp.bfloat16).astype(jnp.float32) @ w2b + b2
    assert jnp.allclose(logits, ref, atol=2e-3, rtol=2e-3), "mismatch vs bf16 reference"

    # Loose sanity check against the pure-f32 PyTorch-equivalent forward.
    ref_f32 = jnp.maximum(x @ w1 + b1, 0.0) @ w2 + b2
    assert jnp.allclose(logits, ref_f32, atol=5e-2, rtol=5e-2), "mismatch vs f32 reference"

    print("KERNEL_OK")
</pallas_src>

<mosaic_0001>
module attributes {stable_mosaic.version = 11 : i64} {
  func.func @_mlp_kernel(%arg0: i32, %arg1: i32, %arg2: memref<16x384xf32, #tpu.memory_space<vmem>>, %arg3: memref<384x512xbf16, #tpu.memory_space<vmem>>, %arg4: memref<1x512xf32, #tpu.memory_space<vmem>>, %arg5: memref<512x128xbf16, #tpu.memory_space<vmem>>, %arg6: memref<1x128xf32, #tpu.memory_space<vmem>>, %arg7: memref<16x128xf32, #tpu.memory_space<vmem>>, %arg8: memref<16x512xf32, #tpu.memory_space<vmem>>) attributes {dimension_semantics = [#tpu.dimension_semantics<parallel>, #tpu.dimension_semantics<arbitrary>], iteration_bounds = array<i64: 1, 1>, scalar_prefetch = 0 : i64, scratch_operands = 1 : i64, tpu.core_type = #tpu.core_type<tc>, window_params = [{transform_indices = @transform_0, window_bounds = array<i64: 16, 384>}, {transform_indices = @transform_1, window_bounds = array<i64: 384, 512>}, {pipeline_mode = #tpu.pipeline_mode<synchronous>, transform_indices = @transform_2, window_bounds = array<i64: 1, 512>}, {pipeline_mode = #tpu.pipeline_mode<synchronous>, transform_indices = @transform_3, window_bounds = array<i64: 512, 128>}, {pipeline_mode = #tpu.pipeline_mode<synchronous>, transform_indices = @transform_4, window_bounds = array<i64: 1, 128>}, {transform_indices = @transform_5, window_bounds = array<i64: 16, 128>}]} {
    %c0 = arith.constant 0 : index
    %c0_0 = arith.constant 0 : index
    %0 = vector.load %arg2[%c0, %c0_0] : memref<16x384xf32, #tpu.memory_space<vmem>>, vector<16x384xf32>
    %1 = arith.truncf %0 : vector<16x384xf32> to vector<16x384xbf16>
    %c0_1 = arith.constant 0 : index
    %c0_2 = arith.constant 0 : index
    %2 = vector.load %arg3[%c0_1, %c0_2] : memref<384x512xbf16, #tpu.memory_space<vmem>>, vector<384x512xbf16>
    %cst = arith.constant dense<0.000000e+00> : vector<16x512xf32>
    %3 = tpu.matmul %1, %2, %cst {dimension_numbers = #tpu.dot_dimension_numbers<[1], [0], [0], [1], [0, 0, 1, 1], [], []>} : vector<16x384xbf16>, vector<384x512xbf16>, vector<16x512xf32> -> vector<16x512xf32>
    %c0_i32 = arith.constant 0 : i32
    %4 = arith.cmpi eq, %arg1, %c0_i32 : i32
    %5 = arith.extui %4 : i1 to i32
    %c0_i32_3 = arith.constant 0 : i32
    %6 = arith.cmpi ne, %5, %c0_i32_3 : i32
    scf.if %6 {
      %c0_8 = arith.constant 0 : index
      %c0_9 = arith.constant 0 : index
      %13 = vector.load %arg8[%c0_8, %c0_9] : memref<16x512xf32, #tpu.memory_space<vmem>>, vector<16x512xf32>
      tpu.vector_store %arg8[%c0_8, %c0_9], %3 {strides = array<i32>} : memref<16x512xf32, #tpu.memory_space<vmem>>, vector<16x512xf32>,
    } else {
    }
    %c0_i32_4 = arith.constant 0 : i32
    %7 = arith.cmpi sgt, %arg1, %c0_i32_4 : i32
    %8 = arith.extui %7 : i1 to i32
    %c0_i32_5 = arith.constant 0 : i32
    %9 = arith.cmpi ne, %8, %c0_i32_5 : i32
    scf.if %9 {
      %c0_8 = arith.constant 0 : index
      %c0_9 = arith.constant 0 : index
      %13 = vector.load %arg8[%c0_8, %c0_9] : memref<16x512xf32, #tpu.memory_space<vmem>>, vector<16x512xf32>
      %14 = arith.addf %13, %3 : vector<16x512xf32>
      %c0_10 = arith.constant 0 : index
      %c0_11 = arith.constant 0 : index
      %15 = vector.load %arg8[%c0_10, %c0_11] : memref<16x512xf32, #tpu.memory_space<vmem>>, vector<16x512xf32>
      tpu.vector_store %arg8[%c0_10, %c0_11], %14 {strides = array<i32>} : memref<16x512xf32, #tpu.memory_space<vmem>>, vector<16x512xf32>,
    } else {
    }
    %c0_i32_6 = arith.constant 0 : i32
    %10 = arith.cmpi eq, %arg1, %c0_i32_6 : i32
    %11 = arith.extui %10 : i1 to i32
    %c0_i32_7 = arith.constant 0 : i32
    %12 = arith.cmpi ne, %11, %c0_i32_7 : i32
    scf.if %12 {
      %c0_8 = arith.constant 0 : index
      %c0_9 = arith.constant 0 : index
      %13 = vector.load %arg8[%c0_8, %c0_9] : memref<16x512xf32, #tpu.memory_space<vmem>>, vector<16x512xf32>
      %c0_10 = arith.constant 0 : index
      %c0_11 = arith.constant 0 : index
      %14 = vector.load %arg4[%c0_10, %c0_11] : memref<1x512xf32, #tpu.memory_space<vmem>>, vector<1x512xf32>
      %15 = vector.broadcast %14 : vector<1x512xf32> to vector<16x512xf32>
      %16 = arith.addf %13, %15 : vector<16x512xf32>
      %cst_12 = arith.constant 0.000000e+00 : f32
      %17 = vector.broadcast %cst_12 : f32 to vector<16x512xf32>
      %18 = arith.maximumf %16, %17 : vector<16x512xf32>
      %19 = arith.truncf %18 : vector<16x512xf32> to vector<16x512xbf16>
      %c0_13 = arith.constant 0 : index
      %c0_14 = arith.constant 0 : index
      %20 = vector.load %arg5[%c0_13, %c0_14] : memref<512x128xbf16, #tpu.memory_space<vmem>>, vector<512x128xbf16>
      %cst_15 = arith.constant dense<0.000000e+00> : vector<16x128xf32>
      %21 = tpu.matmul %19, %20, %cst_15 {dimension_numbers = #tpu.dot_dimension_numbers<[1], [0], [0], [1], [0, 0, 1, 1], [], []>} : vector<16x512xbf16>, vector<512x128xbf16>, vector<16x128xf32> -> vector<16x128xf32>
      %c0_16 = arith.constant 0 : index
      %c0_17 = arith.constant 0 : index
      %22 = vector.load %arg6[%c0_16, %c0_17] : memref<1x128xf32, #tpu.memory_space<vmem>>, vector<1x128xf32>
      %23 = vector.broadcast %22 : vector<1x128xf32> to vector<16x128xf32>
      %24 = arith.addf %21, %23 : vector<16x128xf32>
      %c0_18 = arith.constant 0 : index
      %c0_19 = arith.constant 0 : index
      %25 = vector.load %arg7[%c0_18, %c0_19] : memref<16x128xf32, #tpu.memory_space<vmem>>, vector<16x128xf32>
      tpu.vector_store %arg7[%c0_18, %c0_19], %24 {strides = array<i32>} : memref<16x128xf32, #tpu.memory_space<vmem>>, vector<16x128xf32>,
    } else {
    }
    return
  }
  func.func @transform_0(%arg0: i32, %arg1: i32) -> (i32, i32) {
    %c0_i32 = arith.constant 0 : i32
    return %arg0, %arg1 : i32, i32
  }
  func.func @transform_1(%arg0: i32, %arg1: i32) -> (i32, i32) {
    %c0_i32 = arith.constant 0 : i32
    %c0_i32_0 = arith.constant 0 : i32
    return %arg1, %c0_i32 : i32, i32
  }
  func.func @transform_2(%arg0: i32, %arg1: i32) -> (i32, i32) {
    %c0_i32 = arith.constant 0 : i32
    %c0_i32_0 = arith.constant 0 : i32
    %c0_i32_1 = arith.constant 0 : i32
    return %c0_i32, %c0_i32_0 : i32, i32
  }
  func.func @transform_3(%arg0: i32, %arg1: i32) -> (i32, i32) {
    %c0_i32 = arith.constant 0 : i32
    %c0_i32_0 = arith.constant 0 : i32
    %c0_i32_1 = arith.constant 0 : i32
    return %c0_i32, %c0_i32_0 : i32, i32
  }
  func.func @transform_4(%arg0: i32, %arg1: i32) -> (i32, i32) {
    %c0_i32 = arith.constant 0 : i32
    %c0_i32_0 = arith.constant 0 : i32
    %c0_i32_1 = arith.constant 0 : i32
    return %c0_i32, %c0_i32_0 : i32, i32
  }
  func.func @transform_5(%arg0: i32, %arg1: i32) -> (i32, i32) {
    %c0_i32 = arith.constant 0 : i32
    %c0_i32_0 = arith.constant 0 : i32
    return %arg0, %c0_i32 : i32, i32
  }
}

</mosaic_0001>

<bundles_post_ra>
// kernel: tpu_custom_call.1
= control target key start
LH: loop header
LB: loop body
LE: loop exit
PB: predicated region body
PF: predicated region fallthrough
CT: control target
= control target key end

     0   :  { %10 = vsyncpa [#allocation4], 0  ;;  %s1839_s0 = inlined_call_operand.hbm [shape: f32[16,384], index: 0, kind: input, shape index: {}]   ;;  %s1840_s1 = inlined_call_operand.hbm [shape: bf16[384,512], index: 1, kind: input, shape index: {}]   ;;  %s1841_s2 = inlined_call_operand.vmem [shape: f32[1,512], index: 2, kind: input, shape index: {}]   ;;  %s1842_s3 = inlined_call_operand.hbm [shape: bf16[512,128], index: 3, kind: input, shape index: {}]   ;;  %s1843_s4 = inlined_call_operand.vmem [shape: f32[1,128], index: 4, kind: input, shape index: {}]   ;;  %s1844_s5 = inlined_call_operand.hbm [shape: f32[16,128], index: 5, kind: output, shape index: {}]  }
   0x1   :  { %11 = vsyncpa [#allocation7], 0 }
   0x2   :  { %12 = vsyncpa [#allocation5], 0  ;;  %s1742_s18 = smov [#allocation6]   ;;  %s1648_s22 = scalar_lea.hbm %s1840_s1, 12288 }
   0x3   :  { %s30_s19 = sshll.u32 %s1742_s18, 4  ;;  %p1649_p0 = scmp.ne.s32.totalorder %s1840_s1, %s1648_s22  ;;  %s31_s19 = int_to_ptr.vmem [resolvable:$true] %s30_s19 }
   0x4   :  { %p1652_p1 = scmp.lt.u32.totalorder %s1648_s22, %s1840_s1 }
   0x6   :  { %p1654_p2 = pnand %p1652_p1, %p1649_p0 }
   0x8   :  { %1657 = shalt.err (!%p1654_p2)
}
   0x9   :  { %s1658_s27 = scalar_lea.vmem %s31_s19, 12288  ;;  %p1663_p4 = scmp.lt.s32.totalorder %s31_s19, %s31_s19 }
   0xa   :  { %p1659_p3 = scmp.ne.s32.totalorder %s31_s19, %s1658_s27  ;;  %p1664_p5 = scmp.lt.s32.totalorder %s1658_s27, %s1658_s27 }
   0xc   :  { %p1665_p6 = por %p1664_p5, %p1663_p4 }
   0xe   :  { %p1666_p7 = pnand %p1665_p6, %p1659_p3 }
  0x10   :  { %1669 = shalt.err (!%p1666_p7)
}
  0x11   :  { %s1743_s28 = smov 256   ;;  %s1744_s29 = smov 16  }
  0x12   :  { %36 = dma.hbm_to_vmem [thread:$0]  %s1840_s1, 12288, %s31_s19, [#allocation7], %s1743_s28, %s1743_s28, %s1744_s29  }
  0x13   :  { %s1745_s7 = smov [#allocation3]   ;;  %s1670_s11 = scalar_lea.hbm %s1839_s0, 768 }
  0x14   :  { %s18_s8 = sshll.u32 %s1745_s7, 4  ;;  %p1671_p8 = scmp.ne.s32.totalorder %s1839_s0, %s1670_s11  ;;  %s19_s8 = int_to_ptr.vmem [resolvable:$true] %s18_s8 }
  0x15   :  { %p1674_p9 = scmp.lt.u32.totalorder %s1670_s11, %s1839_s0 }
  0x17   :  { %p1676_p10 = pnand %p1674_p9, %p1671_p8 }
  0x19   :  { %1679 = shalt.err (!%p1676_p10)
}
  0x1a   :  { %s1680_s16 = scalar_lea.vmem %s19_s8, 768  ;;  %p1685_p12 = scmp.lt.s32.totalorder %s19_s8, %s19_s8 }
  0x1b   :  { %p1681_p11 = scmp.ne.s32.totalorder %s19_s8, %s1680_s16  ;;  %p1686_p13 = scmp.lt.s32.totalorder %s1680_s16, %s1680_s16 }
  0x1d   :  { %p1687_p0 = por %p1686_p13, %p1685_p12 }
  0x1f   :  { %p1688_p1 = pnand %p1687_p0, %p1681_p11 }
  0x21   :  { %1691 = shalt.err (!%p1688_p1)
}
  0x22   :  { %s1746_s1 = smov 384   ;;  %s1747_s17 = smov 24  }
  0x23   :  { %24 = dma.hbm_to_vmem [thread:$0]  %s1839_s0, 768, %s19_s8, [#allocation4], %s1746_s1, %s1746_s1, %s1747_s17  }
  0x24   :  { %s1748_s20 = smov [#allocation8]   ;;  %s1692_s24 = scalar_lea.hbm %s1842_s3, 4096 }
  0x25   :  { %s44_s21 = sshll.u32 %s1748_s20, 4  ;;  %p1693_p2 = scmp.ne.s32.totalorder %s1842_s3, %s1692_s24  ;;  %s45_s21 = int_to_ptr.vmem [resolvable:$true] %s44_s21 }
  0x26   :  { %p1696_p3 = scmp.lt.u32.totalorder %s1692_s24, %s1842_s3 }
  0x28   :  { %p1698_p4 = pnand %p1696_p3, %p1693_p2 }
  0x2a   :  { %1701 = shalt.err (!%p1698_p4)
}
  0x2b   :  { %s1702_s29 = scalar_lea.vmem %s45_s21, 4096  ;;  %p1707_p6 = scmp.lt.s32.totalorder %s45_s21, %s45_s21 }
  0x2c   :  { %p1703_p5 = scmp.ne.s32.totalorder %s45_s21, %s1702_s29  ;;  %p1708_p7 = scmp.lt.s32.totalorder %s1702_s29, %s1702_s29 }
  0x2e   :  { %p1709_p8 = por %p1708_p7, %p1707_p6 }
  0x30   :  { %p1710_p9 = pnand %p1709_p8, %p1703_p5 }
  0x32   :  { %1713 = shalt.err (!%p1710_p9)
}
  0x33   :  { %s1749_s0 = smov 64   ;;  %s1750_s30 = smov 4  }
  0x34   :  { %50 = dma.hbm_to_vmem [thread:$0]  %s1842_s3, 4096, %s45_s21, [#allocation7], %s1749_s0, %s1749_s0, %s1750_s30  }
  0x35   :  { %1736 = dma.done.wait [#allocation4], 768  }
  0x36   :  { %1737 = vsyncadd [#allocation4], 4294966528 }
  0x37   :  { %1738 = dma.done.wait [#allocation7], 16384  }
  0x38   :  { %1739 = vsyncadd [#allocation7], 4294950912  ;;  %v1472_v0 = vld [vmem:[#allocation6 + $0x4] ss:$16 sps:$4 sm:$0xff]   ;;  %v1474_v1 = vld [vmem:[#allocation6 + $0xc] ss:$16 sps:$4 sm:$0xff]  }
  0x39   :  { %648 = vmatprep.subr.bf16.mxu0 %v1472_v0  ;;  %v1476_v2 = vld [vmem:[#allocation6] ss:$16 sps:$4 sm:$0xff]   ;;  %v1477_v3 = vld [vmem:[#allocation6 + $0x8] ss:$16 sps:$4 sm:$0xff]   ;;  %734 = vmatprep.subr.bf16.mxu1 %v1474_v1  ;;  %v1478_v4 = vld [vmem:[#allocation6 + $0x24] ss:$16 sps:$4 sm:$0xff]  }
  0x3a   :  { %649 = vmatpush1.bf16.msra.mxu0 %v1476_v2  ;;  %735 = vmatpush1.bf16.msra.mxu1 %v1477_v3  ;;  %v1480_v5 = vld [vmem:[#allocation6 + $0x2c] ss:$16 sps:$4 sm:$0xff]   ;;  %v1482_v6 = vld [vmem:[#allocation6 + $0x20] ss:$16 sps:$4 sm:$0xff]   ;;  %v1483_v7 = vld [vmem:[#allocation6 + $0x28] ss:$16 sps:$4 sm:$0xff]  }
  0x3b   :  { %650 = vmatprep.subr.bf16.mxu0 %v1478_v4  ;;  %736 = vmatprep.subr.bf16.mxu1 %v1480_v5  ;;  %v1484_v8 = vld [vmem:[#allocation6 + $0x44] ss:$16 sps:$4 sm:$0xff]   ;;  %v1486_v9 = vld [vmem:[#allocation6 + $0x4c] ss:$16 sps:$4 sm:$0xff]   ;;  %v1488_v10 = vld [vmem:[#allocation6 + $0x40] ss:$16 sps:$4 sm:$0xff]  }
  0x3c   :  { %v1489_v11 = vld [vmem:[#allocation6 + $0x48] ss:$16 sps:$4 sm:$0xff]   ;;  %v1490_v12 = vld [vmem:[#allocation6 + $0x64] ss:$16 sps:$4 sm:$0xff]   ;;  %v1492_v13 = vld [vmem:[#allocation6 + $0x6c] ss:$16 sps:$4 sm:$0xff]  }
  0x3d   :  { %v1494_v14 = vld [vmem:[#allocation6 + $0x60] ss:$16 sps:$4 sm:$0xff]   ;;  %v1495_v15 = vld [vmem:[#allocation6 + $0x68] ss:$16 sps:$4 sm:$0xff]   ;;  %v1496_v16 = vld [vmem:[#allocation6 + $0x84] ss:$16 sps:$4 sm:$0xff]  }
  0x3e   :  { %651 = vmatpush1.bf16.msra.mxu0 %v1482_v6  ;;  %737 = vmatpush1.bf16.msra.mxu1 %v1483_v7  ;;  %v1498_v17 = vld [vmem:[#allocation6 + $0x8c] ss:$16 sps:$4 sm:$0xff]   ;;  %v1500_v18 = vld [vmem:[#allocation6 + $0x80] ss:$16 sps:$4 sm:$0xff]   ;;  %v1501_v19 = vld [vmem:[#allocation6 + $0x88] ss:$16 sps:$4 sm:$0xff]  }
  0x3f   :  { %652 = vmatprep.subr.bf16.mxu0 %v1484_v8  ;;  %738 = vmatprep.subr.bf16.mxu1 %v1486_v9  ;;  %v1502_v20 = vld [vmem:[#allocation6 + $0xa4] ss:$16 sps:$4 sm:$0xff]   ;;  %v1504_v21 = vld [vmem:[#allocation6 + $0xac] ss:$16 sps:$4 sm:$0xff]   ;;  %v1506_v22 = vld [vmem:[#allocation6 + $0xa0] ss:$16 sps:$4 sm:$0xff]  }
  0x40   :  { %v1507_v23 = vld [vmem:[#allocation6 + $0xa8] ss:$16 sps:$4 sm:$0xff]   ;;  %v1508_v24 = vld [vmem:[#allocation6 + $0xc4] ss:$16 sps:$4 sm:$0xff]   ;;  %v1510_v25 = vld [vmem:[#allocation6 + $0xcc] ss:$16 sps:$4 sm:$0xff]  }
  0x41   :  { %v1512_v26 = vld [vmem:[#allocation6 + $0xc0] ss:$16 sps:$4 sm:$0xff]   ;;  %v1513_v27 = vld [vmem:[#allocation6 + $0xc8] ss:$16 sps:$4 sm:$0xff]   ;;  %v1514_v28 = vld [vmem:[#allocation6 + $0xe4] ss:$16 sps:$4 sm:$0xff]  }
  0x42   :  { %653 = vmatpush1.bf16.msra.mxu0 %v1488_v10  ;;  %739 = vmatpush1.bf16.msra.mxu1 %v1489_v11  ;;  %v1516_v29 = vld [vmem:[#allocation6 + $0xec] ss:$16 sps:$4 sm:$0xff]   ;;  %v1518_v30 = vld [vmem:[#allocation6 + $0xe0] ss:$16 sps:$4 sm:$0xff]   ;;  %v1519_v31 = vld [vmem:[#allocation6 + $0xe8] ss:$16 sps:$4 sm:$0xff]  }
  0x43   :  { %654 = vmatprep.subr.bf16.mxu0 %v1490_v12  ;;  %740 = vmatprep.subr.bf16.mxu1 %v1492_v13  ;;  %v1520_v32 = vld [vmem:[#allocation6 + $0x104] ss:$16 sps:$4 sm:$0xff]   ;;  %v1522_v33 = vld [vmem:[#allocation6 + $0x10c] ss:$16 sps:$4 sm:$0xff]   ;;  %v1524_v34 = vld [vmem:[#allocation6 + $0x100] ss:$16 sps:$4 sm:$0xff]  }
  0x44   :  { %v1525_v35 = vld [vmem:[#allocation6 + $0x108] ss:$16 sps:$4 sm:$0xff]   ;;  %v1526_v36 = vld [vmem:[#allocation6 + $0x124] ss:$16 sps:$4 sm:$0xff]   ;;  %v1528_v37 = vld [vmem:[#allocation6 + $0x12c] ss:$16 sps:$4 sm:$0xff]  }
  0x45   :  { %v1530_v38 = vld [vmem:[#allocation6 + $0x120] ss:$16 sps:$4 sm:$0xff]   ;;  %v1531_v39 = vld [vmem:[#allocation6 + $0x128] ss:$16 sps:$4 sm:$0xff]   ;;  %v1532_v40 = vld [vmem:[#allocation6 + $0x144] ss:$16 sps:$4 sm:$0xff]  }
  0x46   :  { %655 = vmatpush1.bf16.msra.mxu0 %v1494_v14  ;;  %741 = vmatpush1.bf16.msra.mxu1 %v1495_v15  ;;  %v1534_v41 = vld [vmem:[#allocation6 + $0x14c] ss:$16 sps:$4 sm:$0xff]   ;;  %v1536_v42 = vld [vmem:[#allocation6 + $0x140] ss:$16 sps:$4 sm:$0xff]   ;;  %v1537_v43 = vld [vmem:[#allocation6 + $0x148] ss:$16 sps:$4 sm:$0xff]  }
  0x47   :  { %656 = vmatprep.subr.bf16.mxu0 %v1496_v16  ;;  %742 = vmatprep.subr.bf16.mxu1 %v1498_v17  ;;  %v1538_v44 = vld [vmem:[#allocation6 + $0x164] ss:$16 sps:$4 sm:$0xff]   ;;  %v1540_v45 = vld [vmem:[#allocation6 + $0x16c] ss:$16 sps:$4 sm:$0xff]   ;;  %v1542_v48 = vld [vmem:[#allocation6 + $0x160] ss:$16 sps:$4 sm:$0xff]  }
  0x48   :  { %v64_v46 = vld [vmem:[#allocation3 + $0x8] sm:$0xff]  ;;  %v67_v47 = vld [vmem:[#allocation3 + $0x20] sm:$0xff]  ;;  %v66_v5 = vld [vmem:[#allocation3 + $0x18] sm:$0xff]  ;;  %v1751_v17 = vmov 0   ;;  %s1752_s10 = smov [#allocation9]  }
  0x49   :  { %v1543_v49 = vld [vmem:[#allocation6 + $0x168] ss:$16 sps:$4 sm:$0xff]   ;;  %v70_v50 = vpack.c.bf16 %v67_v47, %v64_v46  ;;  %v1544_v51 = vld [vmem:[#allocation6 + $0x184] ss:$16 sps:$4 sm:$0xff]   ;;  %v1546_v52 = vld [vmem:[#allocation6 + $0x18c] ss:$16 sps:$4 sm:$0xff]  }
  0x4a   :  { %657 = vmatpush1.bf16.msra.mxu0 %v1500_v18  ;;  %743 = vmatpush1.bf16.msra.mxu1 %v1501_v19  ;;  %v1548_v53 = vld [vmem:[#allocation6 + $0x180] ss:$16 sps:$4 sm:$0xff]   ;;  %v1549_v54 = vld [vmem:[#allocation6 + $0x188] ss:$16 sps:$4 sm:$0xff]   ;;  %v1550_v55 = vld [vmem:[#allocation6 + $0x1a4] ss:$16 sps:$4 sm:$0xff]  }
  0x4b   :  { %658 = vmatprep.subr.bf16.mxu0 %v1502_v20  ;;  %744 = vmatprep.subr.bf16.mxu1 %v1504_v21  ;;  %v1552_v56 = vld [vmem:[#allocation6 + $0x1ac] ss:$16 sps:$4 sm:$0xff]   ;;  %v1554_v57 = vld [vmem:[#allocation6 + $0x1a0] ss:$16 sps:$4 sm:$0xff]   ;;  %v1555_v58 = vld [vmem:[#allocation6 + $0x1a8] ss:$16 sps:$4 sm:$0xff]  }
  0x4c   :  { %680 = vmatprep.mubr.bf16.mxu0 %v70_v50  ;;  %766 = vmatprep.mubr.bf16.mxu1 %v70_v50  ;;  %v1556_v59 = vld [vmem:[#allocation6 + $0x1c4] ss:$16 sps:$4 sm:$0xff]   ;;  %v1558_v60 = vld [vmem:[#allocation6 + $0x1cc] ss:$16 sps:$4 sm:$0xff]   ;;  %v1560_v61 = vld [vmem:[#allocation6 + $0x1c0] ss:$16 sps:$4 sm:$0xff]  }
  0x4d   :  { %v1561_v62 = vld [vmem:[#allocation6 + $0x1c8] ss:$16 sps:$4 sm:$0xff]   ;;  %v1562_v63 = vld [vmem:[#allocation6 + $0x1e4] ss:$16 sps:$4 sm:$0xff]   ;;  %v1564_v0 = vld [vmem:[#allocation6 + $0x1ec] ss:$16 sps:$4 sm:$0xff]  }
  0x4e   :  { %659 = vmatpush1.bf16.msra.mxu0 %v1506_v22  ;;  %745 = vmatpush1.bf16.msra.mxu1 %v1507_v23  ;;  %v1566_v1 = vld [vmem:[#allocation6 + $0x1e0] ss:$16 sps:$4 sm:$0xff]   ;;  %v1567_v2 = vld [vmem:[#allocation6 + $0x1e8] ss:$16 sps:$4 sm:$0xff]   ;;  %v1570_v3 = vld [vmem:[#allocation6 + $0x204] ss:$16 sps:$4 sm:$0xff]  }
  0x4f   :  { %660 = vmatprep.subr.bf16.mxu0 %v1508_v24  ;;  %746 = vmatprep.subr.bf16.mxu1 %v1510_v25  ;;  %v63_v4 = vld [vmem:[#allocation3] sm:$0xff]  ;;  %v1573_v6 = vld [vmem:[#allocation6 + $0x20c] ss:$16 sps:$4 sm:$0xff]   ;;  %v1571_v9 = vld [vmem:[#allocation6 + $0x208] ss:$16 sps:$4 sm:$0xff]   ;;  %s1265_s11 = sshll.u32 %s1752_s10, 4  ;;  %s1266_s11 = int_to_ptr.vmem [resolvable:$true] %s1265_s11 }
  0x50   :  { %v1568_v7 = vld [vmem:[#allocation6 + $0x200] ss:$16 sps:$4 sm:$0xff]   ;;  %v69_v8 = vpack.c.bf16 %v66_v5, %v63_v4  ;;  %v1576_v10 = vld [vmem:[#allocation6 + $0x224] ss:$16 sps:$4 sm:$0xff]   ;;  %v1579_v11 = vld [vmem:[#allocation6 + $0x22c] ss:$16 sps:$4 sm:$0xff]   ;;  %p1719_p11 = scmp.lt.s32.totalorder %s1266_s11, %s1266_s11 }
  0x51   :  { %v1574_v12 = vld [vmem:[#allocation6 + $0x220] ss:$16 sps:$4 sm:$0xff]   ;;  %v1577_v13 = vld [vmem:[#allocation6 + $0x228] ss:$16 sps:$4 sm:$0xff]   ;;  %v1582_v14 = vld [vmem:[#allocation6 + $0x244] ss:$16 sps:$4 sm:$0xff]  }
  0x52   :  { %661 = vmatpush1.bf16.msra.mxu0 %v1512_v26  ;;  %747 = vmatpush1.bf16.msra.mxu1 %v1513_v27  ;;  %v1585_v15 = vld [vmem:[#allocation6 + $0x24c] ss:$16 sps:$4 sm:$0xff]   ;;  %v1580_v16 = vld [vmem:[#allocation6 + $0x240] ss:$16 sps:$4 sm:$0xff]   ;;  %v1583_v18 = vld [vmem:[#allocation6 + $0x248] ss:$16 sps:$4 sm:$0xff]  }
  0x53   :  { %662 = vmatprep.subr.bf16.mxu0 %v1514_v28  ;;  %748 = vmatprep.subr.bf16.mxu1 %v1516_v29  ;;  %v1588_v19 = vld [vmem:[#allocation6 + $0x264] ss:$16 sps:$4 sm:$0xff]   ;;  %v1591_v20 = vld [vmem:[#allocation6 + $0x26c] ss:$16 sps:$4 sm:$0xff]   ;;  %v1586_v21 = vld [vmem:[#allocation6 + $0x260] ss:$16 sps:$4 sm:$0xff]  }
  0x54   :  { %v1589_v22 = vld [vmem:[#allocation6 + $0x268] ss:$16 sps:$4 sm:$0xff]   ;;  %v1594_v23 = vld [vmem:[#allocation6 + $0x284] ss:$16 sps:$4 sm:$0xff]   ;;  %v1597_v24 = vld [vmem:[#allocation6 + $0x28c] ss:$16 sps:$4 sm:$0xff]  }
  0x55   :  { %v1592_v25 = vld [vmem:[#allocation6 + $0x280] ss:$16 sps:$4 sm:$0xff]   ;;  %v1595_v26 = vld [vmem:[#allocation6 + $0x288] ss:$16 sps:$4 sm:$0xff]   ;;  %v1600_v27 = vld [vmem:[#allocation6 + $0x2a4] ss:$16 sps:$4 sm:$0xff]  }
  0x56   :  { %663 = vmatpush1.bf16.msra.mxu0 %v1518_v30  ;;  %749 = vmatpush1.bf16.msra.mxu1 %v1519_v31  ;;  %v1603_v28 = vld [vmem:[#allocation6 + $0x2ac] ss:$16 sps:$4 sm:$0xff]   ;;  %v1598_v29 = vld [vmem:[#allocation6 + $0x2a0] ss:$16 sps:$4 sm:$0xff]   ;;  %v1601_v30 = vld [vmem:[#allocation6 + $0x2a8] ss:$16 sps:$4 sm:$0xff]  }
  0x57   :  { %664 = vmatprep.subr.bf16.mxu0 %v1520_v32  ;;  %750 = vmatprep.subr.bf16.mxu1 %v1522_v33  ;;  %v1606_v31 = vld [vmem:[#allocation6 + $0x2c4] ss:$16 sps:$4 sm:$0xff]   ;;  %v1609_v32 = vld [vmem:[#allocation6 + $0x2cc] ss:$16 sps:$4 sm:$0xff]   ;;  %v1604_v33 = vld [vmem:[#allocation6 + $0x2c0] ss:$16 sps:$4 sm:$0xff]  }
  0x58   :  { %v1620_v46 = vld [vmem:[#allocation8 + $0x48] sm:$0xff]   ;;  %v1624_v50 = vld [vmem:[#allocation8 + $0x50] sm:$0xff]  }
  0x59   :  { %v1621_v47 = vld [vmem:[#allocation8 + $0xc8] sm:$0xff]   ;;  %v1642_v4 = vld [vmem:[#allocation8 + $0x30] sm:$0xff]  }
  0x5a   :  { %665 = vmatpush1.bf16.msra.mxu0 %v1524_v34  ;;  %751 = vmatpush1.bf16.msra.mxu1 %v1525_v35  ;;  %v1607_v34 = vld [vmem:[#allocation6 + $0x2c8] ss:$16 sps:$4 sm:$0xff]   ;;  %v1612_v35 = vld [vmem:[#allocation6 + $0x2e4] ss:$16 sps:$4 sm:$0xff]  }
  0x5b   :  { %666 = vmatprep.subr.bf16.mxu0 %v1526_v36  ;;  %752 = vmatprep.subr.bf16.mxu1 %v1528_v37  ;;  %v1615_v36 = vld [vmem:[#allocation6 + $0x2ec] ss:$16 sps:$4 sm:$0xff]   ;;  %v1610_v37 = vld [vmem:[#allocation6 + $0x2e0] ss:$16 sps:$4 sm:$0xff]  }
  0x5c   :  { %v1643_v5 = vld [vmem:[#allocation8 + $0xb0] sm:$0xff]  }
  0x5e   :  { %667 = vmatpush1.bf16.msra.mxu0 %v1530_v38  ;;  %753 = vmatpush1.bf16.msra.mxu1 %v1531_v39  ;;  %v1613_v38 = vld [vmem:[#allocation6 + $0x2e8] ss:$16 sps:$4 sm:$0xff]   ;;  %v65_v39 = vld [vmem:[#allocation3 + $0x10] sm:$0xff] }
  0x5f   :  { %668 = vmatprep.subr.bf16.mxu0 %v1532_v40  ;;  %754 = vmatprep.subr.bf16.mxu1 %v1534_v41  ;;  %v68_v40 = vld [vmem:[#allocation3 + $0x28] sm:$0xff]  ;;  %v1616_v41 = vld [vmem:[#allocation8 + $0x40] sm:$0xff]  }
  0x62   :  { %669 = vmatpush1.bf16.msra.mxu0 %v1536_v42  ;;  %755 = vmatpush1.bf16.msra.mxu1 %v1537_v43  ;;  %v1617_v42 = vld [vmem:[#allocation8 + $0xc0] sm:$0xff]   ;;  %v71_v43 = vpack.c.bf16 %v68_v40, %v65_v39 }
  0x63   :  { %670 = vmatprep.subr.bf16.mxu0 %v1538_v44  ;;  %756 = vmatprep.subr.bf16.mxu1 %v1540_v45  ;;  %v1618_v44 = vld [vmem:[#allocation8] sm:$0xff]  }
  0x64   :  { %v1619_v45 = vld [vmem:[#allocation8 + $0x80] sm:$0xff]  }
  0x66   :  { %671 = vmatpush1.bf16.msra.mxu0 %v1542_v48  ;;  %757 = vmatpush1.bf16.msra.mxu1 %v1543_v49  ;;  %v1622_v48 = vld [vmem:[#allocation8 + $0x8] sm:$0xff]  }
  0x67   :  { %672 = vmatprep.subr.bf16.mxu0 %v1544_v51  ;;  %758 = vmatprep.subr.bf16.mxu1 %v1546_v52  ;;  %v1623_v49 = vld [vmem:[#allocation8 + $0x88] sm:$0xff]   ;;  %v1625_v51 = vld [vmem:[#allocation8 + $0xd0] sm:$0xff]  }
  0x68   :  { %v1626_v52 = vld [vmem:[#allocation8 + $0x10] sm:$0xff]  }
  0x6a   :  { %673 = vmatpush1.bf16.msra.mxu0 %v1548_v53  ;;  %759 = vmatpush1.bf16.msra.mxu1 %v1549_v54  ;;  %v1627_v53 = vld [vmem:[#allocation8 + $0x90] sm:$0xff]   ;;  %v1628_v54 = vld [vmem:[#allocation8 + $0x58] sm:$0xff]  }
  0x6b   :  { %674 = vmatprep.subr.bf16.mxu0 %v1550_v55  ;;  %760 = vmatprep.subr.bf16.mxu1 %v1552_v56  ;;  %v1629_v55 = vld [vmem:[#allocation8 + $0xd8] sm:$0xff]  }
  0x6c   :  { %v1630_v56 = vld [vmem:[#allocation8 + $0x18] sm:$0xff]  }
  0x6e   :  { %675 = vmatpush1.bf16.msra.mxu0 %v1554_v57  ;;  %761 = vmatpush1.bf16.msra.mxu1 %v1555_v58  ;;  %v1631_v57 = vld [vmem:[#allocation8 + $0x98] sm:$0xff]   ;;  %v1632_v58 = vld [vmem:[#allocation8 + $0x60] sm:$0xff]  }
  0x6f   :  { %676 = vmatprep.subr.bf16.mxu0 %v1556_v59  ;;  %762 = vmatprep.subr.bf16.mxu1 %v1558_v60  ;;  %v1633_v59 = vld [vmem:[#allocation8 + $0xe0] sm:$0xff]  }
  0x70   :  { %v1634_v60 = vld [vmem:[#allocation8 + $0x20] sm:$0xff]  }
  0x72   :  { %677 = vmatpush1.bf16.msra.mxu0 %v1560_v61  ;;  %763 = vmatpush1.bf16.msra.mxu1 %v1561_v62  ;;  %v1635_v61 = vld [vmem:[#allocation8 + $0xa0] sm:$0xff]   ;;  %v1636_v62 = vld [vmem:[#allocation8 + $0x68] sm:$0xff]  }
  0x73   :  { %678 = vmatprep.subr.bf16.mxu0 %v1562_v63  ;;  %764 = vmatprep.subr.bf16.mxu1 %v1564_v0  ;;  %v1637_v63 = vld [vmem:[#allocation8 + $0xe8] sm:$0xff]  }
  0x74   :  { %v1638_v0 = vld [vmem:[#allocation8 + $0x28] sm:$0xff]  }
  0x76   :  { %679 = vmatpush1.bf16.msra.mxu0 %v1566_v1  ;;  %765 = vmatpush1.bf16.msra.mxu1 %v1567_v2  ;;  %v1639_v1 = vld [vmem:[#allocation8 + $0xa8] sm:$0xff]   ;;  %v1640_v2 = vld [vmem:[#allocation8 + $0x70] sm:$0xff]  }
  0x77   :  { %691 = vmatprep.subr.bf16.mxu0 %v1570_v3  ;;  %777 = vmatprep.subr.bf16.mxu1 %v1573_v6  ;;  %v1641_v3 = vld [vmem:[#allocation8 + $0xf0] sm:$0xff]   ;;  %v1644_v6 = vld [vmem:[#allocation8 + $0x78] sm:$0xff]  }
  0x79   :  { %681 = vmatmul.mubr.bf16.vlgmr.msra.gmra.mrb[0].mxu0 %v69_v8  ;;  %767 = vmatmul.mubr.bf16.vlgmr.msra.gmra.mrb[0].mxu1 %v69_v8  ;;  %v1646_v8 = vld [vmem:[#allocation8 + $0x38] sm:$0xff]  }
  0x7a   :  { %692 = vmatpush1.bf16.msra.mxu0 %v1568_v7  ;;  %778 = vmatpush1.bf16.msra.mxu1 %v1571_v9  ;;  %v1645_v7 = vld [vmem:[#allocation8 + $0xf8] sm:$0xff]  }
  0x7b   :  { %693 = vmatprep.subr.bf16.mxu0 %v1576_v10  ;;  %779 = vmatprep.subr.bf16.mxu1 %v1579_v11  ;;  %v1647_v9 = vld [vmem:[#allocation8 + $0xb8] sm:$0xff]   ;;  %v873_v10 = vlaneseq }
  0x7c   :  { %723 = vmatprep.mubr.bf16.mxu0 %v1751_v17  ;;  %809 = vmatprep.mubr.bf16.mxu1 %v1751_v17 }
  0x7d   :  { %v874_v11 = vshrl.u32 %v873_v10, 7 }
  0x7e   :  { %694 = vmatpush1.bf16.msra.mxu0 %v1574_v12  ;;  %780 = vmatpush1.bf16.msra.mxu1 %v1577_v13 }
  0x7f   :  { %695 = vmatprep.subr.bf16.mxu0 %v1582_v14  ;;  %781 = vmatprep.subr.bf16.mxu1 %v1585_v15  ;;  %v875_v12 = vsub.s32 0, %v874_v11  ;;  %v883_v13 = vsub.s32 2, %v874_v11  ;;  %v871_v14 = vld [vmem:[%s1841_s2] sm:$0xf]  ;;  %v879_v15 = vsub.s32 1, %v874_v11 }
  0x81   :  { %v876_v17 = vrot.slane %v871_v14, %v875_v12 }
  0x82   :  { %696 = vmatpush1.bf16.msra.mxu0 %v1580_v16  ;;  %782 = vmatpush1.bf16.msra.mxu1 %v1583_v18  ;;  %v887_v16 = vsub.s32 3, %v874_v11  ;;  %v884_v18 = vrot.slane %v871_v14, %v883_v13 }
  0x83   :  { %697 = vmatprep.subr.bf16.mxu0 %v1588_v19  ;;  %783 = vmatprep.subr.bf16.mxu1 %v1591_v20  ;;  %v880_v19 = vrot.slane %v871_v14, %v879_v15 }
  0x84   :  { %v888_v20 = vrot.slane %v871_v14, %v887_v16 }
  0x86   :  { %698 = vmatpush1.bf16.msra.mxu0 %v1586_v21  ;;  %784 = vmatpush1.bf16.msra.mxu1 %v1589_v22 }
  0x87   :  { %699 = vmatprep.subr.bf16.mxu0 %v1594_v23  ;;  %785 = vmatprep.subr.bf16.mxu1 %v1597_v24 }
  0x8a   :  { %700 = vmatpush1.bf16.msra.mxu0 %v1592_v25  ;;  %786 = vmatpush1.bf16.msra.mxu1 %v1595_v26 }
  0x8b   :  { %701 = vmatprep.subr.bf16.mxu0 %v1600_v27  ;;  %787 = vmatprep.subr.bf16.mxu1 %v1603_v28 }
  0x8e   :  { %702 = vmatpush1.bf16.msra.mxu0 %v1598_v29  ;;  %788 = vmatpush1.bf16.msra.mxu1 %v1601_v30 }
  0x8f   :  { %703 = vmatprep.subr.bf16.mxu0 %v1606_v31  ;;  %789 = vmatprep.subr.bf16.mxu1 %v1609_v32 }
  0x92   :  { %704 = vmatpush1.bf16.msra.mxu0 %v1604_v33  ;;  %790 = vmatpush1.bf16.msra.mxu1 %v1607_v34 }
  0x93   :  { %705 = vmatprep.subr.bf16.mxu0 %v1612_v35  ;;  %791 = vmatprep.subr.bf16.mxu1 %v1615_v36 }
  0x96   :  { %706 = vmatpush1.bf16.msra.mxu0 %v1610_v37  ;;  %792 = vmatpush1.bf16.msra.mxu1 %v1613_v38 }
  0x97   :  { %1407 = vmatprep.subr.bf16.mxu0 %v1616_v41  ;;  %1429 = vmatprep.subr.bf16.mxu1 %v1617_v42 }
  0x99   :  { %724 = vmatmul.mubr.bf16.vlgmr.msra.gmra.mrb[0].mxu0 %v71_v43  ;;  %810 = vmatmul.mubr.bf16.vlgmr.msra.gmra.mrb[0].mxu1 %v71_v43 }
  0x9a   :  { %1408 = vmatpush3.bf16.msra.mxu0 %v1618_v44  ;;  %1430 = vmatpush3.bf16.msra.mxu1 %v1619_v45 }
  0x9b   :  { %1409 = vmatprep.subr.bf16.mxu0 %v1620_v46  ;;  %1431 = vmatprep.subr.bf16.mxu1 %v1621_v47 }
  0x9e   :  { %1410 = vmatpush3.bf16.msra.mxu0 %v1622_v48  ;;  %1432 = vmatpush3.bf16.msra.mxu1 %v1623_v49 }
  0x9f   :  { %1411 = vmatprep.subr.bf16.mxu0 %v1624_v50  ;;  %1433 = vmatprep.subr.bf16.mxu1 %v1625_v51  ;;  %v1374_v51 = vld [vmem:[%s1843_s4] ss:$0 sm:$0xff]  ;;  %s1714_s4 = scalar_lea.vmem %s1266_s11, 256 }
  0xa0   :  { %p1715_p10 = scmp.ne.s32.totalorder %s1266_s11, %s1714_s4  ;;  %p1720_p12 = scmp.lt.s32.totalorder %s1714_s4, %s1714_s4 }
  0xa2   :  { %1412 = vmatpush3.bf16.msra.mxu0 %v1626_v52  ;;  %1434 = vmatpush3.bf16.msra.mxu1 %v1627_v53  ;;  %p1721_p13 = por %p1720_p12, %p1719_p11 }
  0xa3   :  { %1413 = vmatprep.subr.bf16.mxu0 %v1628_v54  ;;  %1435 = vmatprep.subr.bf16.mxu1 %v1629_v55 }
  0xa4   :  { %p1722_p0 = pnand %p1721_p13, %p1715_p10 }
  0xa6   :  { %1414 = vmatpush3.bf16.msra.mxu0 %v1630_v56  ;;  %1436 = vmatpush3.bf16.msra.mxu1 %v1631_v57 }
  0xa7   :  { %1415 = vmatprep.subr.bf16.mxu0 %v1632_v58  ;;  %1437 = vmatprep.subr.bf16.mxu1 %v1633_v59 }
  0xaa   :  { %1416 = vmatpush3.bf16.msra.mxu0 %v1634_v60  ;;  %1438 = vmatpush3.bf16.msra.mxu1 %v1635_v61 }
  0xab   :  { %1417 = vmatprep.subr.bf16.mxu0 %v1636_v62  ;;  %1439 = vmatprep.subr.bf16.mxu1 %v1637_v63 }
  0xae   :  { %1418 = vmatpush3.bf16.msra.mxu0 %v1638_v0  ;;  %1440 = vmatpush3.bf16.msra.mxu1 %v1639_v1 }
  0xaf   :  { %1419 = vmatprep.subr.bf16.mxu0 %v1640_v2  ;;  %1441 = vmatprep.subr.bf16.mxu1 %v1641_v3 }
  0xb2   :  { %1420 = vmatpush3.bf16.msra.mxu0 %v1642_v4  ;;  %1442 = vmatpush3.bf16.msra.mxu1 %v1643_v5 }
  0xb3   :  { %1421 = vmatprep.subr.bf16.mxu0 %v1644_v6  ;;  %1443 = vmatprep.subr.bf16.mxu1 %v1645_v7 }
  0xb6   :  { %1422 = vmatpush3.bf16.msra.mxu0 %v1646_v8  ;;  %1444 = vmatpush3.bf16.msra.mxu1 %v1647_v9 }
 0x16c   :  { %v725_v21 = vpop.f32.mrb[0].mxu0  ;;  %v811_v22 = vpop.f32.mrb[0].mxu1 }
 0x16d   :  { %v893_v23 = vadd.f32 %v876_v17, %v725_v21  ;;  %v895_v24 = vadd.f32 %v884_v18, %v811_v22  ;;  %v727_v25 = vpop.f32.mrb[1].mxu0  ;;  %v813_v26 = vpop.f32.mrb[1].mxu1 }
 0x16e   :  { %v894_v27 = vadd.f32 %v880_v19, %v727_v25  ;;  %v896_v28 = vadd.f32 %v888_v20, %v813_v26  ;;  %v729_v29 = vpop.f32.mrb[2].mxu0  ;;  %v815_v30 = vpop.f32.mrb[2].mxu1 }
 0x16f   :  { %v897_v31 = vadd.f32 %v876_v17, %v729_v29  ;;  %v899_v32 = vadd.f32 %v884_v18, %v815_v30  ;;  %v731_v33 = vpop.f32.mrb[3].mxu0  ;;  %v817_v34 = vpop.f32.mrb[3].mxu1  ;;  %v901_v37 = vmax.f32 %v893_v23, 0.0  ;;  %v903_v38 = vmax.f32 %v895_v24, 0.0 }
 0x170   :  { %v898_v35 = vadd.f32 %v880_v19, %v731_v33  ;;  %v900_v36 = vadd.f32 %v888_v20, %v817_v34  ;;  %v902_v41 = vmax.f32 %v894_v27, 0.0  ;;  %v904_v42 = vmax.f32 %v896_v28, 0.0 }
 0x171   :  { %v905_v39 = vmax.f32 %v897_v31, 0.0  ;;  %v907_v40 = vmax.f32 %v899_v32, 0.0 }
 0x172   :  { %v906_v43 = vmax.f32 %v898_v35, 0.0  ;;  %v908_v44 = vmax.f32 %v900_v36, 0.0 }
 0x173   :  { %v909_v45 = vpack.c.bf16 %v905_v39, %v901_v37  ;;  %v911_v46 = vpack.c.bf16 %v907_v40, %v903_v38 }
 0x174   :  { %v910_v47 = vpack.c.bf16 %v906_v43, %v902_v41  ;;  %v912_v48 = vpack.c.bf16 %v908_v44, %v904_v42 }
 0x176   :  { %1208 = vmatprep.mubr.bf16.mxu0 %v910_v47  ;;  %1249 = vmatprep.mubr.bf16.mxu1 %v912_v48 }
 0x177   :  { %1209 = vmatmul.mubr.bf16.vlgmr.msra.gmra.mrb[4].mxu0 %v909_v45  ;;  %1250 = vmatmul.mubr.bf16.vlgmr.msra.gmra.mrb[4].mxu1 %v911_v46 }
 0x24a   :  { %v1423_v49 = vpop.f32.mrb[4].mxu0  ;;  %v1445_v50 = vpop.f32.mrb[4].mxu1 }
 0x24b   :  { %v1424_v52 = vpop.f32.mrb[5].mxu0  ;;  %v1446_v53 = vpop.f32.mrb[5].mxu1 }
 0x24c   :  { %v1425_v54 = vadd.f32 %v1424_v52, %v1423_v49  ;;  %v1447_v55 = vadd.f32 %v1446_v53, %v1445_v50  ;;  %v1426_v56 = vpop.f32.mrb[6].mxu0  ;;  %v1448_v57 = vpop.f32.mrb[6].mxu1 }
 0x24d   :  { %v1427_v58 = vpop.f32.mrb[7].mxu0  ;;  %v1449_v59 = vpop.f32.mrb[7].mxu1 }
 0x24e   :  { %v1211_v60 = vadd.f32 %v1425_v54, %v1374_v51  ;;  %v1428_v61 = vadd.f32 %v1427_v58, %v1426_v56  ;;  %v1450_v62 = vadd.f32 %v1449_v59, %v1448_v57 }
 0x250   :  { %v1252_v63 = vadd.f32 %v1447_v55, %v1211_v60  ;;  %v1214_v0 = vadd.f32 %v1428_v61, %v1374_v51 }
 0x252   :  { %1258 = vst [vmem:[#allocation9] sm:$0xff] %v1252_v63  ;;  %v1255_v1 = vadd.f32 %v1450_v62, %v1214_v0 }
 0x254   :  { %1259 = vst [vmem:[#allocation9 + $0x8] sm:$0xff] %v1255_v1 }
 0x255   :  { %1725 = shalt.err (!%p1722_p0)
}
 0x256   :  { %s1726_s14 = scalar_lea.hbm %s1844_s5, 256 }
 0x257   :  { %p1727_p1 = scmp.ne.s32.totalorder %s1844_s5, %s1726_s14  ;;  %p1730_p2 = scmp.lt.u32.totalorder %s1726_s14, %s1844_s5 }
 0x259   :  { %p1732_p3 = pnand %p1730_p2, %p1727_p1 }
 0x25b   :  { %1735 = shalt.err (!%p1732_p3)
}
 0x25c   :  { %s1753_s18 = smov 128   ;;  %s1754_s19 = smov 8  }
 0x25d   :  { %1271 = dma.vmem_to_hbm [thread:$0]  %s1266_s11, 256, %s1844_s5, [#allocation5], %s1753_s18, %s1753_s18, %s1754_s19  }
 0x25e   :  { %1740 = dma.done.wait [#allocation5], 256  }
 0x25f   :  { %1741 = vsyncadd [#allocation5], 4294967040 }
 0x260   :  { %1275 = vsyncpa [#allocation4], 1 }
 0x261   :  { %1276 = vsyncpa [#allocation7], 1 }
 0x262   :  { %1277 = vsyncpa [#allocation5], 1 }

</bundles_post_ra>
